<compile_context>
chip_gen: v7x
topology: tpu7x:2x2x1
jax: 0.10.0
libtpu: 0.0.40
codegen_flags: <defaults>
</compile_context>

<pallas_src>
import functools

import jax
import jax.numpy as jnp
from jax import lax
from jax.experimental import pallas as pl
from jax.experimental.pallas import tpu as pltpu


def _fused_conv_kernel(x_ref, w_ref, b_ref, o_ref, *, cin, kh, kw, wp, l_out):
    """Fused im2col + VPU weighted-sum conv for one batch element.

    x_ref: (Cin, Lin)  zero-padded input rows, flattened over (h, padded-w).
    w_ref: (N, K)      K = Cin*kh*kw, ordered (cin, dh, dw) = PyTorch OIHW.
    b_ref: (N, 1)      bias.
    o_ref: (N, L_out)  conv output over flattened (h, padded-w) positions.
                       Columns w >= W_out of each row are cross-row garbage and
                       are sliced off in the epilogue.
    """
    n = o_ref.shape[0]
    acc = jnp.zeros((n, l_out), dtype=jnp.float32)
    k = 0
    for c in range(cin):
        for dh in range(kh):
            for dw in range(kw):
                shift = dh * wp + dw
                # (1, L_out) shifted slice of the flattened input rows (VMEM only).
                xs = x_ref[c:c + 1, shift:shift + l_out].astype(jnp.float32)
                # (N, 1) column of the weight matrix.
                wk = w_ref[:, k:k + 1].astype(jnp.float32)
                # Broadcast-FMA on the VPU: (N,1) * (1,L) accumulated in f32.
                acc = acc + wk * xs
                k += 1
    acc = acc + b_ref[...].astype(jnp.float32)
    o_ref[...] = acc.astype(o_ref.dtype)


@functools.partial(jax.jit, static_argnames=("r", "kernel_size"))
def sp_conv_transpose2d(x, weight, bias, r, kernel_size):
    """Forward of SPConvTranspose2d.

    x:      (B, Cin, H, W)         NCHW
    weight: (Cout*r, Cin, kh, kw)  PyTorch OIHW
    bias:   (Cout*r,)
    returns (B, Cout, H_out, W_out * r)
    """
    kh, kw = kernel_size
    B, Cin, H, W = x.shape
    N = weight.shape[0]            # out_channels * r
    Cout = N // r

    Wp = W + 2                     # ConstantPad2d((1, 1, 0, 0))
    H_out = H - kh + 1
    W_out = Wp - kw + 1
    K = Cin * kh * kw
    L_out = H_out * Wp             # flattened (h, padded-w) output positions
    Lin = (H + 1) * Wp             # +1 zero row keeps all shifted slices in-bounds

    # Width pad (the module's ConstantPad2d) + one trailing zero row, then a
    # free row-major flatten of (H+1, Wp).  This is the only prologue copy.
    x_pad = jnp.pad(x, ((0, 0), (0, 0), (0, 1), (1, 1)))
    x_flat = x_pad.reshape(B, Cin, Lin)

    w2 = weight.reshape(N, K).astype(x.dtype)   # K ordered (cin, dh, dw)
    b2 = bias.reshape(N, 1).astype(x.dtype)

    kernel = functools.partial(
        _fused_conv_kernel, cin=Cin, kh=kh, kw=kw, wp=Wp, l_out=L_out)

    conv_flat = pl.pallas_call(
        kernel,
        out_shape=jax.ShapeDtypeStruct((B, N, L_out), x.dtype),
        grid_spec=pltpu.PrefetchScalarGridSpec(
            num_scalar_prefetch=0,
            grid=(B,),
            in_specs=[
                pl.BlockSpec((None, Cin, Lin), lambda b: (b, 0, 0)),  # input slab
                pl.BlockSpec((N, K), lambda b: (0, 0)),               # weights
                pl.BlockSpec((N, 1), lambda b: (0, 0)),               # bias
            ],
            out_specs=pl.BlockSpec((None, N, L_out), lambda b: (b, 0, 0)),
        ),
        compiler_params=pltpu.CompilerParams(
            dimension_semantics=("parallel",)),
    )(x_flat, w2, b2)

    # Epilogue (XLA): drop the kw-1 garbage columns per row, then the sub-pixel
    # rearrangement.  conv channel n = ri*Cout + c  ->  out[b, c, h, w*r + ri].
    conv = conv_flat.reshape(B, N, H_out, Wp)[:, :, :, :W_out]   # (B, N, H_out, W_out)
    o = conv.reshape(B, r, Cout, H_out, W_out)
    o = o.transpose(0, 2, 3, 4, 1)                               # (B, Cout, H, W, r)
    return o.reshape(B, Cout, H_out, W_out * r)


def _reference(x, weight, bias, r, kernel_size):
    """Pure-JAX reference mirroring the PyTorch forward (f32-exact conv)."""
    kh, kw = kernel_size
    B = x.shape[0]
    N = weight.shape[0]
    Cout = N // r
    x_pad = jnp.pad(x, ((0, 0), (0, 0), (0, 0), (1, 1)))
    conv = lax.conv_general_dilated(
        x_pad, weight, window_strides=(1, 1), padding="VALID",
        dimension_numbers=("NCHW", "OIHW", "NCHW"),
        precision=lax.Precision.HIGHEST)
    conv = conv + bias.reshape(1, N, 1, 1)
    _, _, H_out, W_out = conv.shape
    o = conv.reshape(B, r, Cout, H_out, W_out)
    o = o.transpose(0, 2, 3, 4, 1)
    return o.reshape(B, Cout, H_out, W_out * r)


if __name__ == "__main__":
    # Small shapes consistent with the module's forward.
    B, Cin, H, W = 2, 4, 16, 16
    Cout, r = 4, 2
    kernel_size = (1, 3)           # typical SPConvTranspose2d usage
    kh, kw = kernel_size

    key = jax.random.PRNGKey(0)
    kx, kw_key, kb_key = jax.random.split(key, 3)
    x = jax.random.normal(kx, (B, Cin, H, W), dtype=jnp.float32)
    # nn.Conv2d(in_channels, out_channels*r, kernel_size) parameter shapes.
    fan_in = Cin * kh * kw
    bound = 1.0 / (fan_in ** 0.5)
    weight = jax.random.uniform(kw_key, (Cout * r, Cin, kh, kw),
                                minval=-bound, maxval=bound, dtype=jnp.float32)
    bias = jax.random.uniform(kb_key, (Cout * r,),
                              minval=-bound, maxval=bound, dtype=jnp.float32)

    out = sp_conv_transpose2d(x, weight, bias, r, kernel_size)
    out = jax.block_until_ready(out)

    ref = _reference(x, weight, bias, r, kernel_size)
    assert out.shape == (B, Cout, H, W * r), out.shape
    assert jnp.allclose(out, ref, atol=1e-5, rtol=1e-5), float(
        jnp.max(jnp.abs(out - ref)))

    print("KERNEL_OK")
</pallas_src>

<mosaic_0001>
module attributes {stable_mosaic.version = 11 : i64} {
  func.func @_fused_conv_kernel(%arg0: i32, %arg1: memref<1x4x306xf32, #tpu.memory_space<vmem>>, %arg2: memref<8x12xf32, #tpu.memory_space<vmem>>, %arg3: memref<8x1xf32, #tpu.memory_space<vmem>>, %arg4: memref<1x8x288xf32, #tpu.memory_space<vmem>>) attributes {dimension_semantics = [#tpu.dimension_semantics<parallel>], iteration_bounds = array<i64: 2>, scalar_prefetch = 0 : i64, scratch_operands = 0 : i64, tpu.core_type = #tpu.core_type<tc>, window_params = [{transform_indices = @transform_0, window_bounds = array<i64: 1, 4, 306>}, {pipeline_mode = #tpu.pipeline_mode<synchronous>, transform_indices = @transform_1, window_bounds = array<i64: 8, 12>}, {pipeline_mode = #tpu.pipeline_mode<synchronous>, transform_indices = @transform_2, window_bounds = array<i64: 8, 1>}, {transform_indices = @transform_3, window_bounds = array<i64: 1, 8, 288>}]} {
    %cst = arith.constant 0.000000e+00 : f32
    %0 = vector.broadcast %cst : f32 to vector<8x288xf32>
    %c0 = arith.constant 0 : index
    %c0_0 = arith.constant 0 : index
    %c0_1 = arith.constant 0 : index
    %1 = vector.load %arg1[%c0, %c0_0, %c0_1] : memref<1x4x306xf32, #tpu.memory_space<vmem>>, vector<1x1x288xf32>
    %2 = vector.shape_cast %1 : vector<1x1x288xf32> to vector<1x288xf32>
    %c0_2 = arith.constant 0 : index
    %c0_3 = arith.constant 0 : index
    %3 = vector.load %arg2[%c0_2, %c0_3] : memref<8x12xf32, #tpu.memory_space<vmem>>, vector<8x1xf32>
    %4 = vector.broadcast %3 : vector<8x1xf32> to vector<8x288xf32>
    %5 = vector.broadcast %2 : vector<1x288xf32> to vector<8x288xf32>
    %6 = arith.mulf %4, %5 : vector<8x288xf32>
    %7 = arith.addf %0, %6 : vector<8x288xf32>
    %c0_4 = arith.constant 0 : index
    %c0_5 = arith.constant 0 : index
    %c1 = arith.constant 1 : index
    %8 = vector.load %arg1[%c0_4, %c0_5, %c1] : memref<1x4x306xf32, #tpu.memory_space<vmem>>, vector<1x1x288xf32>
    %9 = vector.shape_cast %8 : vector<1x1x288xf32> to vector<1x288xf32>
    %c0_6 = arith.constant 0 : index
    %c1_7 = arith.constant 1 : index
    %10 = vector.load %arg2[%c0_6, %c1_7] : memref<8x12xf32, #tpu.memory_space<vmem>>, vector<8x1xf32>
    %11 = vector.broadcast %10 : vector<8x1xf32> to vector<8x288xf32>
    %12 = vector.broadcast %9 : vector<1x288xf32> to vector<8x288xf32>
    %13 = arith.mulf %11, %12 : vector<8x288xf32>
    %14 = arith.addf %7, %13 : vector<8x288xf32>
    %c0_8 = arith.constant 0 : index
    %c0_9 = arith.constant 0 : index
    %c2 = arith.constant 2 : index
    %15 = vector.load %arg1[%c0_8, %c0_9, %c2] : memref<1x4x306xf32, #tpu.memory_space<vmem>>, vector<1x1x288xf32>
    %16 = vector.shape_cast %15 : vector<1x1x288xf32> to vector<1x288xf32>
    %c0_10 = arith.constant 0 : index
    %c2_11 = arith.constant 2 : index
    %17 = vector.load %arg2[%c0_10, %c2_11] : memref<8x12xf32, #tpu.memory_space<vmem>>, vector<8x1xf32>
    %18 = vector.broadcast %17 : vector<8x1xf32> to vector<8x288xf32>
    %19 = vector.broadcast %16 : vector<1x288xf32> to vector<8x288xf32>
    %20 = arith.mulf %18, %19 : vector<8x288xf32>
    %21 = arith.addf %14, %20 : vector<8x288xf32>
    %c0_12 = arith.constant 0 : index
    %c1_13 = arith.constant 1 : index
    %c0_14 = arith.constant 0 : index
    %22 = vector.load %arg1[%c0_12, %c1_13, %c0_14] : memref<1x4x306xf32, #tpu.memory_space<vmem>>, vector<1x1x288xf32>
    %23 = vector.shape_cast %22 : vector<1x1x288xf32> to vector<1x288xf32>
    %c0_15 = arith.constant 0 : index
    %c3 = arith.constant 3 : index
    %24 = vector.load %arg2[%c0_15, %c3] : memref<8x12xf32, #tpu.memory_space<vmem>>, vector<8x1xf32>
    %25 = vector.broadcast %24 : vector<8x1xf32> to vector<8x288xf32>
    %26 = vector.broadcast %23 : vector<1x288xf32> to vector<8x288xf32>
    %27 = arith.mulf %25, %26 : vector<8x288xf32>
    %28 = arith.addf %21, %27 : vector<8x288xf32>
    %c0_16 = arith.constant 0 : index
    %c1_17 = arith.constant 1 : index
    %c1_18 = arith.constant 1 : index
    %29 = vector.load %arg1[%c0_16, %c1_17, %c1_18] : memref<1x4x306xf32, #tpu.memory_space<vmem>>, vector<1x1x288xf32>
    %30 = vector.shape_cast %29 : vector<1x1x288xf32> to vector<1x288xf32>
    %c0_19 = arith.constant 0 : index
    %c4 = arith.constant 4 : index
    %31 = vector.load %arg2[%c0_19, %c4] : memref<8x12xf32, #tpu.memory_space<vmem>>, vector<8x1xf32>
    %32 = vector.broadcast %31 : vector<8x1xf32> to vector<8x288xf32>
    %33 = vector.broadcast %30 : vector<1x288xf32> to vector<8x288xf32>
    %34 = arith.mulf %32, %33 : vector<8x288xf32>
    %35 = arith.addf %28, %34 : vector<8x288xf32>
    %c0_20 = arith.constant 0 : index
    %c1_21 = arith.constant 1 : index
    %c2_22 = arith.constant 2 : index
    %36 = vector.load %arg1[%c0_20, %c1_21, %c2_22] : memref<1x4x306xf32, #tpu.memory_space<vmem>>, vector<1x1x288xf32>
    %37 = vector.shape_cast %36 : vector<1x1x288xf32> to vector<1x288xf32>
    %c0_23 = arith.constant 0 : index
    %c5 = arith.constant 5 : index
    %38 = vector.load %arg2[%c0_23, %c5] : memref<8x12xf32, #tpu.memory_space<vmem>>, vector<8x1xf32>
    %39 = vector.broadcast %38 : vector<8x1xf32> to vector<8x288xf32>
    %40 = vector.broadcast %37 : vector<1x288xf32> to vector<8x288xf32>
    %41 = arith.mulf %39, %40 : vector<8x288xf32>
    %42 = arith.addf %35, %41 : vector<8x288xf32>
    %c0_24 = arith.constant 0 : index
    %c2_25 = arith.constant 2 : index
    %c0_26 = arith.constant 0 : index
    %43 = vector.load %arg1[%c0_24, %c2_25, %c0_26] : memref<1x4x306xf32, #tpu.memory_space<vmem>>, vector<1x1x288xf32>
    %44 = vector.shape_cast %43 : vector<1x1x288xf32> to vector<1x288xf32>
    %c0_27 = arith.constant 0 : index
    %c6 = arith.constant 6 : index
    %45 = vector.load %arg2[%c0_27, %c6] : memref<8x12xf32, #tpu.memory_space<vmem>>, vector<8x1xf32>
    %46 = vector.broadcast %45 : vector<8x1xf32> to vector<8x288xf32>
    %47 = vector.broadcast %44 : vector<1x288xf32> to vector<8x288xf32>
    %48 = arith.mulf %46, %47 : vector<8x288xf32>
    %49 = arith.addf %42, %48 : vector<8x288xf32>
    %c0_28 = arith.constant 0 : index
    %c2_29 = arith.constant 2 : index
    %c1_30 = arith.constant 1 : index
    %50 = vector.load %arg1[%c0_28, %c2_29, %c1_30] : memref<1x4x306xf32, #tpu.memory_space<vmem>>, vector<1x1x288xf32>
    %51 = vector.shape_cast %50 : vector<1x1x288xf32> to vector<1x288xf32>
    %c0_31 = arith.constant 0 : index
    %c7 = arith.constant 7 : index
    %52 = vector.load %arg2[%c0_31, %c7] : memref<8x12xf32, #tpu.memory_space<vmem>>, vector<8x1xf32>
    %53 = vector.broadcast %52 : vector<8x1xf32> to vector<8x288xf32>
    %54 = vector.broadcast %51 : vector<1x288xf32> to vector<8x288xf32>
    %55 = arith.mulf %53, %54 : vector<8x288xf32>
    %56 = arith.addf %49, %55 : vector<8x288xf32>
    %c0_32 = arith.constant 0 : index
    %c2_33 = arith.constant 2 : index
    %c2_34 = arith.constant 2 : index
    %57 = vector.load %arg1[%c0_32, %c2_33, %c2_34] : memref<1x4x306xf32, #tpu.memory_space<vmem>>, vector<1x1x288xf32>
    %58 = vector.shape_cast %57 : vector<1x1x288xf32> to vector<1x288xf32>
    %c0_35 = arith.constant 0 : index
    %c8 = arith.constant 8 : index
    %59 = vector.load %arg2[%c0_35, %c8] : memref<8x12xf32, #tpu.memory_space<vmem>>, vector<8x1xf32>
    %60 = vector.broadcast %59 : vector<8x1xf32> to vector<8x288xf32>
    %61 = vector.broadcast %58 : vector<1x288xf32> to vector<8x288xf32>
    %62 = arith.mulf %60, %61 : vector<8x288xf32>
    %63 = arith.addf %56, %62 : vector<8x288xf32>
    %c0_36 = arith.constant 0 : index
    %c3_37 = arith.constant 3 : index
    %c0_38 = arith.constant 0 : index
    %64 = vector.load %arg1[%c0_36, %c3_37, %c0_38] : memref<1x4x306xf32, #tpu.memory_space<vmem>>, vector<1x1x288xf32>
    %65 = vector.shape_cast %64 : vector<1x1x288xf32> to vector<1x288xf32>
    %c0_39 = arith.constant 0 : index
    %c9 = arith.constant 9 : index
    %66 = vector.load %arg2[%c0_39, %c9] : memref<8x12xf32, #tpu.memory_space<vmem>>, vector<8x1xf32>
    %67 = vector.broadcast %66 : vector<8x1xf32> to vector<8x288xf32>
    %68 = vector.broadcast %65 : vector<1x288xf32> to vector<8x288xf32>
    %69 = arith.mulf %67, %68 : vector<8x288xf32>
    %70 = arith.addf %63, %69 : vector<8x288xf32>
    %c0_40 = arith.constant 0 : index
    %c3_41 = arith.constant 3 : index
    %c1_42 = arith.constant 1 : index
    %71 = vector.load %arg1[%c0_40, %c3_41, %c1_42] : memref<1x4x306xf32, #tpu.memory_space<vmem>>, vector<1x1x288xf32>
    %72 = vector.shape_cast %71 : vector<1x1x288xf32> to vector<1x288xf32>
    %c0_43 = arith.constant 0 : index
    %c10 = arith.constant 10 : index
    %73 = vector.load %arg2[%c0_43, %c10] : memref<8x12xf32, #tpu.memory_space<vmem>>, vector<8x1xf32>
    %74 = vector.broadcast %73 : vector<8x1xf32> to vector<8x288xf32>
    %75 = vector.broadcast %72 : vector<1x288xf32> to vector<8x288xf32>
    %76 = arith.mulf %74, %75 : vector<8x288xf32>
    %77 = arith.addf %70, %76 : vector<8x288xf32>
    %c0_44 = arith.constant 0 : index
    %c3_45 = arith.constant 3 : index
    %c2_46 = arith.constant 2 : index
    %78 = vector.load %arg1[%c0_44, %c3_45, %c2_46] : memref<1x4x306xf32, #tpu.memory_space<vmem>>, vector<1x1x288xf32>
    %79 = vector.shape_cast %78 : vector<1x1x288xf32> to vector<1x288xf32>
    %c0_47 = arith.constant 0 : index
    %c11 = arith.constant 11 : index
    %80 = vector.load %arg2[%c0_47, %c11] : memref<8x12xf32, #tpu.memory_space<vmem>>, vector<8x1xf32>
    %81 = vector.broadcast %80 : vector<8x1xf32> to vector<8x288xf32>
    %82 = vector.broadcast %79 : vector<1x288xf32> to vector<8x288xf32>
    %83 = arith.mulf %81, %82 : vector<8x288xf32>
    %84 = arith.addf %77, %83 : vector<8x288xf32>
    %c0_48 = arith.constant 0 : index
    %c0_49 = arith.constant 0 : index
    %85 = vector.load %arg3[%c0_48, %c0_49] : memref<8x1xf32, #tpu.memory_space<vmem>>, vector<8x1xf32>
    %86 = vector.broadcast %85 : vector<8x1xf32> to vector<8x288xf32>
    %87 = arith.addf %84, %86 : vector<8x288xf32>
    %c0_50 = arith.constant 0 : index
    %c0_51 = arith.constant 0 : index
    %c0_52 = arith.constant 0 : index
    %88 = vector.load %arg4[%c0_50, %c0_51, %c0_52] : memref<1x8x288xf32, #tpu.memory_space<vmem>>, vector<1x8x288xf32>
    %89 = vector.shape_cast %88 : vector<1x8x288xf32> to vector<8x288xf32>
    %90 = vector.shape_cast %87 : vector<8x288xf32> to vector<1x8x288xf32>
    tpu.vector_store %arg4[%c0_50, %c0_51, %c0_52], %90 {strides = array<i32>} : memref<1x8x288xf32, #tpu.memory_space<vmem>>, vector<1x8x288xf32>,
    return
  }
  func.func @transform_0(%arg0: i32) -> (i32, i32, i32) {
    %c0_i32 = arith.constant 0 : i32
    %c0_i32_0 = arith.constant 0 : i32
    %c0_i32_1 = arith.constant 0 : i32
    return %arg0, %c0_i32, %c0_i32_0 : i32, i32, i32
  }
  func.func @transform_1(%arg0: i32) -> (i32, i32) {
    %c0_i32 = arith.constant 0 : i32
    %c0_i32_0 = arith.constant 0 : i32
    %c0_i32_1 = arith.constant 0 : i32
    return %c0_i32, %c0_i32_0 : i32, i32
  }
  func.func @transform_2(%arg0: i32) -> (i32, i32) {
    %c0_i32 = arith.constant 0 : i32
    %c0_i32_0 = arith.constant 0 : i32
    %c0_i32_1 = arith.constant 0 : i32
    return %c0_i32, %c0_i32_0 : i32, i32
  }
  func.func @transform_3(%arg0: i32) -> (i32, i32, i32) {
    %c0_i32 = arith.constant 0 : i32
    %c0_i32_0 = arith.constant 0 : i32
    %c0_i32_1 = arith.constant 0 : i32
    return %arg0, %c0_i32, %c0_i32_0 : i32, i32, i32
  }
}

</mosaic_0001>

<bundles_post_ra>
// kernel: sp_conv_transpose2d.1
= control target key start
LH: loop header
LB: loop body
LE: loop exit
PB: predicated region body
PF: predicated region fallthrough
CT: control target
= control target key end

     0   :  { %s636_s12 = smov 0   ;;  %s789_s0 = inlined_call_operand.vmem [shape: f32[2,4,306], index: 0, kind: input, shape index: {}]   ;;  %s790_s1 = inlined_call_operand.vmem [shape: f32[8,12], index: 1, kind: input, shape index: {}]   ;;  %s791_s2 = inlined_call_operand.vmem [shape: f32[8,1], index: 2, kind: input, shape index: {}]   ;;  %s792_s3 = inlined_call_operand.vmem [shape: f32[2,8,288], index: 3, kind: output, shape index: {}]  }
   0x1 LB: > { %s546_s13 = sadd.s32 4294967295, %s600_s12   ;;  %p550_p0 = scmp.ge.s32.totalorder %s600_s12, 1  ;;  %s600_s12 = sphi %s636_s12, %s13_s12  }
   0x2   : > { %p137_p1 = scmp.lt.s32.totalorder %s600_s12, 3 }
   0x4   : > { %p138_p2 = pnand %p550_p0, %p137_p1 }
   0x5   : > { %v172_v0 = vld [vmem:[%s790_s1] sm:$0xff] (!%p138_p2)  ;;  %v602_v1 = vmov (!%p138_p2), 1   ;;  %v603_v2 = vmov (!%p138_p2), 4   ;;  %v604_v3 = vmov (!%p138_p2), 2   ;;  %v605_v4 = vmov (!%p138_p2), 5   ;;  %p161_p3 = scmp.lt.s32.totalorder (!%p138_p2), %s546_s13, 1 }
   0x6   : > { %141 = sbr.rel (%p138_p2) target bundleno = 310 (0x136), region = 32  ;;  %582 = vset.pattern.permute.xlu0 (!%p138_p2), %v602_v1  ;;  %584 = vset.pattern.permute.xlu1 (!%p138_p2), %v603_v2  ;;  %v606_v5 = vmov (!%p138_p2), 7   ;;  %v607_v6 = vmov (!%p138_p2), 8   ;;  %v608_v7 = vmov (!%p138_p2), 10   ;;  %v609_v8 = vmov (!%p138_p2), 9   ;;  %v478_v11 = vld [vmem:[%s791_s2] sm:$0xff] (!%p138_p2) }
   0x7   : > { %201 = vperm.xlu0 (!%p138_p2), %582, %v172_v0   ;;  %279 = vperm.xlu1 (!%p138_p2), %584, %v172_v0   ;;  %v610_v9 = vmov (!%p138_p2), 11   ;;  %v611_v10 = vmov (!%p138_p2), 0   ;;  %v612_v12 = vmov (!%p138_p2), 3   ;;  %v613_v13 = vmov (!%p138_p2), 6   ;;  %s614_s22 = smov (!%p138_p2), 127   ;;  %s615_s23 = smov (!%p138_p2), 126  }
   0x8   : > { %v179_v14 = vlaneseq (!%p138_p2)  ;;  %vm216_vm0 = vcmask (!%p138_p2), 1039360   ;;  %vm241_vm1 = vcmask (!%p138_p2), 1031168   ;;  %vm489_vm2 = vcmask (!%p138_p2), 261120  }
   0xa   : > { %v180_v15 = vshrl.u32 (!%p138_p2), %v179_v14, 7 }
   0xb   : > { %583 = vset.pattern.permute.xlu0 (!%p138_p2), %v604_v3  ;;  %585 = vset.pattern.permute.xlu1 (!%p138_p2), %v605_v4 }
   0xc   : > { %226 = vperm.xlu0 (!%p138_p2), %583, %v172_v0   ;;  %303 = vperm.xlu1 (!%p138_p2), %585, %v172_v0   ;;  %v662_v16 = vsub.s32 (!%p138_p2), 0, %v180_v15  ;;  %v185_v17 = vsub.s32 (!%p138_p2), 1, %v180_v15  ;;  %v189_v19 = vsub.s32 (!%p138_p2), 2, %v180_v15 }
   0xd   : > { %s794_s13 = smov (!%p161_p3, %s546_s13), 1 }
   0xe   : > { %s558_s18 = smul.u32 12, %s794_s13 }
   0xf   : > { %s559_s24 = smul.u32 24, %s794_s13 }
  0x10   : > { %586 = vset.pattern.permute.xlu1 %v606_v5  ;;  %587 = vset.pattern.permute.xlu0 %v607_v6  ;;  %s660_s21 = scalar_lea.vmem %s789_s0, %s558_s18 }
  0x11   : > { %355 = vperm.xlu1 %586, %v172_v0   ;;  %379 = vperm.xlu0 %587, %v172_v0   ;;  %v171_v18 = vld [vmem:[%s660_s21] ss:$4 sm:$0x7]  ;;  %v553_v26 = vld [vmem:[%s660_s21 + $0x1] ss:$4 sm:$0x7]  ;;  %s170_s27 = scalar_lea.vmem %s792_s3, %s559_s24 }
  0x12   : > { %v666_v20 = vrot.slane %v171_v18, %v662_v16  ;;  %v668_v21 = vrot.slane %v171_v18, %v185_v17  ;;  %v670_v23 = vrot.slane %v171_v18, %v189_v19  ;;  %v681_v32 = vrot.slane %v553_v26, %v185_v17  ;;  %v554_v40 = vld [vmem:[%s660_s21 + $0x2] ss:$4 sm:$0x7]  ;;  %v555_v51 = vld [vmem:[%s660_s21 + $0x3] ss:$4 sm:$0x7] }
  0x13   : > { %v686_v34 = vrot.slane %v553_v26, %v662_v16  ;;  %v691_v37 = vrot.slane %v553_v26, %v189_v19  ;;  %v701_v42 = vrot.slane %v554_v40, %v662_v16  ;;  %v704_v44 = vrot.slane %v554_v40, %v189_v19 }
  0x14   : > { %v712_v49 = vrot.slane %v554_v40, %v185_v17  ;;  %v718_v53 = vrot.slane %v555_v51, %v189_v19  ;;  %v725_v59 = vrot.slane %v555_v51, %v185_v17  ;;  %v729_v60 = vrot.slane %v555_v51, %v662_v16 }
  0x15   : > { %588 = vset.pattern.permute.xlu1 %v608_v7  ;;  %592 = vset.pattern.permute.xlu0 %v609_v8 }
  0x16   : > { %431 = vperm.xlu1 %588, %v172_v0   ;;  %405 = vperm.xlu0 %592, %v172_v0  }
  0x1a   : > { %589 = vset.pattern.permute.xlu1 %v610_v9  ;;  %593 = vset.pattern.permute.xlu0 %v611_v10 }
  0x1b   : > { %455 = vperm.xlu1 %589, %v172_v0   ;;  %175 = vperm.xlu0 %593, %v172_v0  }
  0x1f   : > { %590 = vset.pattern.permute.xlu1 %v612_v12  ;;  %481 = vperm.xlu0 %593, %v478_v11  }
  0x20   : > { %253 = vperm.xlu1 %590, %v172_v0  }
  0x24   : > { %591 = vset.pattern.permute.xlu1 %v613_v13 }
  0x25   : > { %329 = vperm.xlu1 %591, %v172_v0  }
  0x86   : > { %v202_v22 = vpop.permute.xlu0 %201  ;;  %v280_v30 = vpop.permute.xlu1 %279 }
  0x87   : > { %v204_v24 = vmul.f32 %v202_v22, %v666_v20  ;;  %v205_v25 = vmul.f32 %v202_v22, %v668_v21  ;;  %v206_v27 = vmul.f32 %v202_v22, %v670_v23  ;;  %v283_v35 = vmul.f32 %v280_v30, %v681_v32 }
  0x88   : > { %v282_v38 = vmul.f32 %v280_v30, %v686_v34  ;;  %v284_v41 = vmul.f32 %v280_v30, %v691_v37 }
  0x89   : > { %212 = vrot.lane.b32.xlu0 %v205_v25, %s614_s22  ;;  %210 = vrot.lane.b32.xlu1 %v204_v24, %s614_s22 }
  0x8b   : > { %v227_v28 = vpop.permute.xlu0 %226  ;;  %v304_v36 = vpop.permute.xlu1 %303 }
  0x8c   : > { %v229_v29 = vmul.f32 %v227_v28, %v666_v20  ;;  %v230_v31 = vmul.f32 %v227_v28, %v668_v21  ;;  %v231_v33 = vmul.f32 %v227_v28, %v670_v23  ;;  %v306_v39 = vmul.f32 %v304_v36, %v686_v34 }
  0x8d   : > { %214 = vrot.lane.b32.xlu1 %v206_v27, %s614_s22  ;;  %v308_v45 = vmul.f32 %v304_v36, %v691_v37  ;;  %v307_v46 = vmul.f32 %v304_v36, %v681_v32 }
  0x8e   : > { %235 = vrot.lane.b32.xlu0 %v229_v29, %s615_s23 }
  0x90   : > { %v356_v43 = vpop.permute.xlu1 %355  ;;  %v380_v50 = vpop.permute.xlu0 %379 }
  0x91   : > { %237 = vrot.lane.b32.xlu1 %v230_v31, %s615_s23  ;;  %v358_v47 = vmul.f32 %v356_v43, %v701_v42  ;;  %v360_v48 = vmul.f32 %v356_v43, %v704_v44  ;;  %v383_v52 = vmul.f32 %v380_v50, %v712_v49  ;;  %v359_v54 = vmul.f32 %v356_v43, %v712_v49 }
  0x92   : > { %239 = vrot.lane.b32.xlu0 %v231_v33, %s615_s23  ;;  %v382_v56 = vmul.f32 %v380_v50, %v701_v42  ;;  %v384_v62 = vmul.f32 %v380_v50, %v704_v44 }
  0x95   : > { %290 = vrot.lane.b32.xlu1 %v283_v35, %s614_s22  ;;  %v432_v55 = vpop.permute.xlu1 %431  ;;  %v744_v3 = vpop.permute.xlu0 %405 }
  0x96   : > { %288 = vrot.lane.b32.xlu0 %v282_v38, %s614_s22  ;;  %v436_v57 = vmul.f32 %v432_v55, %v718_v53  ;;  %v434_v63 = vmul.f32 %v432_v55, %v729_v60  ;;  %v435_v0 = vmul.f32 %v432_v55, %v725_v59 }
  0x99   : > { %312 = vrot.lane.b32.xlu1 %v306_v39, %s615_s23 }
  0x9a   : > { %292 = vrot.lane.b32.xlu0 %v284_v41, %s614_s22  ;;  %v456_v58 = vpop.permute.xlu1 %455  ;;  %v176_v5 = vpop.permute.xlu0 %175 }
  0x9b   : > { %v459_v61 = vmul.f32 %v456_v58, %v725_v59  ;;  %v458_v1 = vmul.f32 %v456_v58, %v729_v60  ;;  %v460_v2 = vmul.f32 %v456_v58, %v718_v53  ;;  %v194_v10 = vmul.f32 %v666_v20, %v176_v5 }
  0x9c   : > { %v196_v11 = vmul.f32 %v670_v23, %v176_v5  ;;  %v195_v13 = vmul.f32 %v668_v21, %v176_v5 }
  0x9d   : > { %316 = vrot.lane.b32.xlu1 %v308_v45, %s615_s23 }
  0x9e   : > { %314 = vrot.lane.b32.xlu0 %v307_v46, %s615_s23  ;;  %v746_v7 = vpop.permute.xlu0 %481 }
  0x9f   : > { %v254_v4 = vpop.permute.xlu1 %253 }
  0xa0   : > { %v272_v22 = vmul.f32 %v686_v34, %v254_v4  ;;  %v274_v23 = vmul.f32 %v691_v37, %v254_v4  ;;  %v273_v28 = vmul.f32 %v681_v32, %v254_v4 }
  0xa1   : > { %364 = vrot.lane.b32.xlu1 %v358_v47, %s614_s22 }
  0xa2   : > { %368 = vrot.lane.b32.xlu0 %v360_v48, %s614_s22 }
  0xa4   : > { %v330_v6 = vpop.permute.xlu1 %329 }
  0xa5   : > { %366 = vrot.lane.b32.xlu1 %v359_v54, %s614_s22  ;;  %v350_v43 = vmul.f32 %v704_v44, %v330_v6  ;;  %v348_v48 = vmul.f32 %v701_v42, %v330_v6 }
  0xa6   : > { %390 = vrot.lane.b32.xlu0 %v383_v52, %s615_s23  ;;  %v349_v52 = vmul.f32 %v712_v49, %v330_v6  ;;  %v424_v49 = vmul.f32 %v729_v60, %v744_v3 }
  0xa9   : > { %388 = vrot.lane.b32.xlu1 %v382_v56, %s615_s23 }
  0xaa   : > { %444 = vrot.lane.b32.xlu0 %v436_v57, %s614_s22 }
  0xad   : > { %392 = vrot.lane.b32.xlu1 %v384_v62, %s615_s23 }
  0xae   : > { %466 = vrot.lane.b32.xlu0 %v459_v61, %s615_s23 }
  0xb1   : > { %440 = vrot.lane.b32.xlu1 %v434_v63, %s614_s22 }
  0xb5   : > { %442 = vrot.lane.b32.xlu1 %v435_v0, %s614_s22 }
  0xb9   : > { %464 = vrot.lane.b32.xlu1 %v458_v1, %s615_s23 }
  0xbd   : > { %468 = vrot.lane.b32.xlu1 %v460_v2, %s615_s23 }
  0xfb   : > { %v213_v8 = vpop.permute.xlu0 %212  ;;  %v211_v9 = vpop.permute.xlu1 %210 }
  0xfc   : > { %v217_v14 = vsel %vm216_vm0, %v211_v9, %v213_v8 }
  0xfd   : > { %v222_v17 = vadd.f32 %v217_v14, %v194_v10  ;;  %v425_v14 = vmul.f32 %v725_v59, %v744_v3 }
  0xff   : > { %v215_v12 = vpop.permute.xlu1 %214 }
 0x100   : > { %v236_v15 = vpop.permute.xlu0 %235  ;;  %v218_v16 = vsel %vm216_vm0, %v213_v8, %v215_v12  ;;  %v224_v18 = vadd.f32 %v215_v12, %v196_v11  ;;  %v426_v11 = vmul.f32 %v718_v53, %v744_v3 }
 0x101   : > { %v223_v24 = vadd.f32 %v218_v16, %v195_v13 }
 0x103   : > { %v238_v19 = vpop.permute.xlu1 %237 }
 0x104   : > { %v242_v25 = vsel %vm241_vm1, %v236_v15, %v238_v19  ;;  %v240_v20 = vpop.permute.xlu0 %239 }
 0x105   : > { %v247_v26 = vadd.f32 %v242_v25, %v222_v17  ;;  %v243_v21 = vsel %vm241_vm1, %v238_v19, %v240_v20  ;;  %v249_v27 = vadd.f32 %v240_v20, %v224_v18 }
 0x106   : > { %v248_v29 = vadd.f32 %v243_v21, %v223_v24 }
 0x107   : > { %v291_v30 = vpop.permute.xlu1 %290  ;;  %v275_v31 = vadd.f32 %v272_v22, %v247_v26  ;;  %v277_v33 = vadd.f32 %v274_v23, %v249_v27 }
 0x108   : > { %v289_v35 = vpop.permute.xlu0 %288  ;;  %v276_v36 = vadd.f32 %v273_v28, %v248_v29 }
 0x109   : > { %v294_v39 = vsel %vm216_vm0, %v289_v35, %v291_v30 }
 0x10a   : > { %v299_v45 = vadd.f32 %v294_v39, %v275_v31 }
 0x10b   : > { %v313_v38 = vpop.permute.xlu1 %312 }
 0x10c   : > { %v293_v34 = vpop.permute.xlu0 %292 }
 0x10d   : > { %v295_v40 = vsel %vm216_vm0, %v291_v30, %v293_v34  ;;  %v301_v41 = vadd.f32 %v293_v34, %v277_v33 }
 0x10e   : > { %v300_v46 = vadd.f32 %v295_v40, %v276_v36 }
 0x10f   : > { %v317_v37 = vpop.permute.xlu1 %316 }
 0x110   : > { %v325_v47 = vadd.f32 %v317_v37, %v301_v41  ;;  %v315_v32 = vpop.permute.xlu0 %314 }
 0x111   : > { %v318_v50 = vsel %vm241_vm1, %v313_v38, %v315_v32  ;;  %v319_v51 = vsel %vm241_vm1, %v315_v32, %v317_v37 }
 0x112   : > { %v323_v54 = vadd.f32 %v318_v50, %v299_v45  ;;  %v324_v55 = vadd.f32 %v319_v51, %v300_v46  ;;  %v353_v56 = vadd.f32 %v350_v43, %v325_v47 }
 0x113   : > { %v365_v57 = vpop.permute.xlu1 %364 }
 0x114   : > { %v352_v58 = vadd.f32 %v349_v52, %v324_v55  ;;  %v351_v61 = vadd.f32 %v348_v48, %v323_v54  ;;  %v369_v62 = vpop.permute.xlu0 %368 }
 0x115   : > { %v377_v6 = vadd.f32 %v369_v62, %v353_v56 }
 0x117   : > { %v367_v44 = vpop.permute.xlu1 %366 }
 0x118   : > { %v370_v63 = vsel %vm216_vm0, %v365_v57, %v367_v44  ;;  %v391_v0 = vpop.permute.xlu0 %390  ;;  %v371_v42 = vsel %vm216_vm0, %v367_v44, %v369_v62 }
 0x119   : > { %v375_v1 = vadd.f32 %v370_v63, %v351_v61  ;;  %v376_v8 = vadd.f32 %v371_v42, %v352_v58 }
 0x11b   : > { %v389_v2 = vpop.permute.xlu1 %388 }
 0x11c   : > { %v394_v4 = vsel %vm241_vm1, %v389_v2, %v391_v0  ;;  %v445_v60 = vpop.permute.xlu0 %444 }
 0x11d   : > { %v399_v5 = vadd.f32 %v394_v4, %v375_v1 }
 0x11f   : > { %v393_v9 = vpop.permute.xlu1 %392  ;;  %v427_v10 = vadd.f32 %v424_v49, %v399_v5 }
 0x120   : > { %v395_v12 = vsel %vm241_vm1, %v391_v0, %v393_v9  ;;  %v401_v13 = vadd.f32 %v393_v9, %v377_v6  ;;  %v467_v24 = vpop.permute.xlu0 %466 }
 0x121   : > { %v400_v15 = vadd.f32 %v395_v12, %v376_v8 }
 0x122   : > { %v429_v16 = vadd.f32 %v426_v11, %v401_v13 }
 0x123   : > { %v441_v17 = vpop.permute.xlu1 %440  ;;  %v428_v18 = vadd.f32 %v425_v14, %v400_v15 }
 0x124   : > { %v453_v21 = vadd.f32 %v445_v60, %v429_v16 }
 0x127   : > { %v443_v19 = vpop.permute.xlu1 %442 }
 0x128   : > { %v446_v22 = vsel %vm216_vm0, %v441_v17, %v443_v19  ;;  %v447_v53 = vsel %vm216_vm0, %v443_v19, %v445_v60 }
 0x129   : > { %v451_v25 = vadd.f32 %v446_v22, %v427_v10  ;;  %v452_v59 = vadd.f32 %v447_v53, %v428_v18 }
 0x12b   : > { %v465_v20 = vpop.permute.xlu1 %464 }
 0x12c   : > { %v470_v23 = vsel %vm241_vm1, %v465_v20, %v467_v24 }
 0x12d   : > { %v475_v26 = vadd.f32 %v470_v23, %v451_v25 }
 0x12f   : > { %v484_v3 = vadd.f32 %v746_v7, %v475_v26  ;;  %v469_v27 = vpop.permute.xlu1 %468 }
 0x130   : > { %v471_v28 = vsel %vm241_vm1, %v467_v24, %v469_v27  ;;  %v477_v29 = vadd.f32 %v469_v27, %v453_v21 }
 0x131   : > { %487 = vst [vmem:[%s170_s27] sm:$0xff] %v484_v3  ;;  %v476_v30 = vadd.f32 %v471_v28, %v452_v59 }
 0x132   : > { %v486_v31 = vadd.f32 %v746_v7, %v477_v29 }
 0x133   : > { %v485_v33 = vadd.f32 %v746_v7, %v476_v30 }
 0x134   : > { %490 = vst.msk [vmem:[%s170_s27 + $0x10] sm:$0xff] %vm489_vm2, %v486_v31 }
 0x135   : > { %488 = vst [vmem:[%s170_s27 + $0x8] sm:$0xff] %v485_v33 }
 0x136 PF: > { %s13_s12 = sadd.s32 1, %s600_s12  }
 0x137   : > { %p10_p4 = scmp.ge.s32.totalorder %s13_s12, 4  }
 0x139   :  { %12 = sbr.rel (!%p10_p4) target bundleno = 1 (0x1), region = 65 }

</bundles_post_ra>
